<compile_context>
chip_gen: v7x
topology: tpu7x:2x2x1
jax: 0.10.0
libtpu: 0.0.40
codegen_flags: <defaults>
</compile_context>

<pallas_src>
import functools

import jax
import jax.numpy as jnp
from jax.experimental import pallas as pl
from jax.experimental.pallas import tpu as pltpu


def _default_vmem_limit():
    """Generation-aware VMEM budget (~75% of physical VMEM, 48 MiB fallback)."""
    try:
        cap = int(pltpu.get_tpu_info().vmem_capacity_bytes)
    except Exception:  # interpret mode / query unavailable
        return 48 * 1024 * 1024
    return max(32 * 1024 * 1024, min((cap * 3) // 4, 96 * 1024 * 1024))


# ---------------------------------------------------------------------------
# Kernels
# ---------------------------------------------------------------------------

def _ffm_fused_kernel(inv_hw, compute_dtype,
                      fsp_ref, fcp_ref, w0s_ref, w0c_ref, scale_ref, shift_ref,
                      w1_ref, w2_ref, out_ref):
    """One whole image per grid step; feat never leaves VMEM."""
    # Cast to bf16 in VMEM (inputs are streamed from HBM in their native dtype).
    xs = fsp_ref[0].astype(compute_dtype)
    xc = fcp_ref[0].astype(compute_dtype)

    # ConvBNReLU (1x1): two MXU dots into one f32 accumulator (no concat needed).
    feat = jnp.dot(xs, w0s_ref[...], preferred_element_type=jnp.float32)
    feat = feat + jnp.dot(xc, w0c_ref[...], preferred_element_type=jnp.float32)
    feat = jnp.maximum(feat * scale_ref[...] + shift_ref[...], 0.0)      # (HW, Cout) f32

    # SE-style attention: global avg pool -> 1x1 -> relu -> 1x1 -> sigmoid (+1)
    pooled = jnp.sum(feat, axis=0, keepdims=True) * inv_hw               # (1, Cout)
    a = jnp.maximum(jnp.dot(pooled, w1_ref[...], preferred_element_type=jnp.float32), 0.0)
    atten = jax.nn.sigmoid(jnp.dot(a, w2_ref[...], preferred_element_type=jnp.float32)) + 1.0

    # feat * atten + feat == feat * (atten + 1)
    out_ref[0] = (feat * atten).astype(out_ref.dtype)


def _ffm_pool_kernel(compute_dtype,
                     fsp_ref, fcp_ref, w0s_ref, w0c_ref, scale_ref, shift_ref,
                     psum_ref):
    """Tiled-path pass 1: only the running spatial sum of feat; feat is NOT
    written to HBM (it is recomputed in pass 2).

    NOTE (correctness-critical): psum_ref's block index is constant along the
    tile axis (axis 2), which must stay "arbitrary" so the accumulator block
    remains resident across the t-loop. Do not mark axis 2 "parallel" or
    reorder the grid axes.
    """
    t = pl.program_id(2)

    @pl.when(t == 0)
    def _():
        psum_ref[...] = jnp.zeros_like(psum_ref)

    xs = fsp_ref[0].astype(compute_dtype)
    xc = fcp_ref[0].astype(compute_dtype)
    feat = jnp.dot(xs, w0s_ref[...], preferred_element_type=jnp.float32)
    feat = feat + jnp.dot(xc, w0c_ref[...], preferred_element_type=jnp.float32)
    feat = jnp.maximum(feat * scale_ref[...] + shift_ref[...], 0.0)      # (Thw, Cout) f32

    psum_ref[0, 0] = psum_ref[0, 0] + jnp.sum(feat, axis=0, keepdims=True)


def _ffm_recompute_apply_kernel(inv_hw, compute_dtype,
                                fsp_ref, fcp_ref, w0s_ref, w0c_ref,
                                scale_ref, shift_ref, w1_ref, w2_ref,
                                psum_ref, out_ref):
    """Tiled-path pass 2: combine partial pools, tiny SE matmuls, recompute the
    feat tile from the inputs, and apply out = feat * (atten + 1)."""
    # psum_ref: (n_splits, 1, 1, Cout) partial spatial sums for this image.
    pooled = jnp.sum(psum_ref[...], axis=(0, 1)) * inv_hw                # (1, Cout)
    a = jnp.maximum(jnp.dot(pooled, w1_ref[...], preferred_element_type=jnp.float32), 0.0)
    atten = jax.nn.sigmoid(jnp.dot(a, w2_ref[...], preferred_element_type=jnp.float32)) + 1.0

    xs = fsp_ref[0].astype(compute_dtype)
    xc = fcp_ref[0].astype(compute_dtype)
    feat = jnp.dot(xs, w0s_ref[...], preferred_element_type=jnp.float32)
    feat = feat + jnp.dot(xc, w0c_ref[...], preferred_element_type=jnp.float32)
    feat = jnp.maximum(feat * scale_ref[...] + shift_ref[...], 0.0)

    out_ref[0] = (feat * atten).astype(out_ref.dtype)


# ---------------------------------------------------------------------------
# Tile picking
# ---------------------------------------------------------------------------

def _divisors(n):
    small, large = [], []
    d = 1
    while d * d <= n:
        if n % d == 0:
            small.append(d)
            if d != n // d:
                large.append(n // d)
        d += 1
    return small + large[::-1]


def _pick_hw_tile(hw, budget_bytes, bytes_per_row):
    """Largest divisor of `hw` that fits the VMEM budget; prefers 16-row
    alignment (bf16 sublane packing), then 8-row. Degrades gracefully instead
    of silently returning `hw` when nothing fits."""
    cap = budget_bytes // max(bytes_per_row, 1)
    if hw <= cap:
        return hw
    divs = _divisors(hw)
    for align in (16, 8):
        cands = [d for d in divs if d % align == 0 and d <= cap]
        if cands:
            return max(cands)
    cands = [d for d in divs if 1 < d <= cap]
    if cands:
        return max(cands)
    over = [d for d in divs if d > 1]
    return min(over) if over else hw


# ---------------------------------------------------------------------------
# Wrapper
# ---------------------------------------------------------------------------

def feature_fusion_module(fsp, fcp, params, *, compute_dtype=jnp.bfloat16,
                          out_dtype=None, hw_tile=None, hw_splits=None,
                          vmem_limit_bytes=None):
    """fsp: (N,H,W,c_sp), fcp: (N,H,W,c_cp) NHWC. Returns (N,H,W,Cout).

    out_dtype=None keeps the input dtype (module semantics); pass
    out_dtype=jnp.bfloat16 when the consumer accepts bf16 to halve the output
    HBM stream (biggest single stream; matters most on v5e).
    """
    w0_sp, w0_cp, bn_scale, bn_shift, w1, w2 = params
    N, H, W, c_sp = fsp.shape
    c_cp = fcp.shape[-1]
    HW = H * W
    Cout = w0_sp.shape[1]
    Cmid = w1.shape[1]
    if out_dtype is None:
        out_dtype = fsp.dtype
    if vmem_limit_bytes is None:
        vmem_limit_bytes = _default_vmem_limit()
    vmem_limit_bytes = int(vmem_limit_bytes)

    # NO activation cast here (would round-trip the inputs through HBM as a
    # separate convert HLO); kernels cast to bf16 in VMEM just before the dots.
    x_sp = fsp.reshape(N, HW, c_sp)
    x_cp = fcp.reshape(N, HW, c_cp)
    w0s = w0_sp.astype(compute_dtype)
    w0c = w0_cp.astype(compute_dtype)
    scale = bn_scale.reshape(1, Cout).astype(jnp.float32)
    shift = bn_shift.reshape(1, Cout).astype(jnp.float32)
    w1f = w1.astype(jnp.float32)
    w2f = w2.astype(jnp.float32)

    in_b = x_sp.dtype.itemsize
    cd_b = jnp.dtype(compute_dtype).itemsize
    out_b = jnp.dtype(out_dtype).itemsize
    cin = c_sp + c_cp
    budget = vmem_limit_bytes // 2  # headroom for weights / pipeline scratch

    # per-spatial-row VMEM estimates (double-buffered streams + in-kernel temps)
    fused_row = 2 * (cin * in_b + Cout * out_b) + cin * cd_b + Cout * 4
    pass1_row = 2 * cin * in_b + cin * cd_b + Cout * 4
    pass2_row = 2 * (cin * in_b + Cout * out_b) + cin * cd_b + Cout * 4

    common_compiler = dict(vmem_limit_bytes=vmem_limit_bytes)

    if hw_tile is None and hw_splits is None and HW * fused_row <= budget:
        # ---- single fused kernel: whole image per grid step -----------------
        out = pl.pallas_call(
            functools.partial(_ffm_fused_kernel, 1.0 / HW, compute_dtype),
            out_shape=jax.ShapeDtypeStruct((N, HW, Cout), out_dtype),
            grid=(N,),
            in_specs=[
                pl.BlockSpec((1, HW, c_sp), lambda n: (n, 0, 0)),
                pl.BlockSpec((1, HW, c_cp), lambda n: (n, 0, 0)),
                pl.BlockSpec((c_sp, Cout), lambda n: (0, 0)),
                pl.BlockSpec((c_cp, Cout), lambda n: (0, 0)),
                pl.BlockSpec((1, Cout), lambda n: (0, 0)),
                pl.BlockSpec((1, Cout), lambda n: (0, 0)),
                pl.BlockSpec((Cout, Cmid), lambda n: (0, 0)),
                pl.BlockSpec((Cmid, Cout), lambda n: (0, 0)),
            ],
            out_specs=pl.BlockSpec((1, HW, Cout), lambda n: (n, 0, 0)),
            compiler_params=pltpu.CompilerParams(
                dimension_semantics=("parallel",), **common_compiler),
        )(x_sp, x_cp, w0s, w0c, scale, shift, w1f, w2f)
        return out.reshape(N, H, W, Cout)

    # ---- HW-tiled two-pass path (no feat round trip through HBM) ------------
    # Split the tile axis across cores for tiny batches (v7x has 2 TCs and the
    # resident-accumulator tile axis must stay "arbitrary").
    if hw_splits is None:
        n_splits = 2 if (N == 1 and HW % 2 == 0 and (HW // 2) % 8 == 0) else 1
    else:
        n_splits = int(hw_splits)
    if n_splits < 1 or HW % n_splits != 0:
        n_splits = 1
    hw_per_split = HW // n_splits

    if hw_tile is not None:
        t1 = t2 = int(hw_tile)
    else:
        t1 = _pick_hw_tile(hw_per_split, budget, pass1_row)   # pass 1: no big output
        t2 = _pick_hw_tile(HW, budget, pass2_row)             # pass 2: + out stream
    if hw_per_split % t1 != 0:
        raise ValueError(f"pass-1 tile {t1} must divide H*W/splits={hw_per_split}")
    if HW % t2 != 0:
        raise ValueError(f"pass-2 tile {t2} must divide H*W={HW}")
    tiles1 = hw_per_split // t1
    tiles2 = HW // t2

    # Pass 1: per-(split, image) partial spatial sums of feat. The psum block
    # index is constant along the tile axis -> resident accumulator; the tile
    # axis MUST be "arbitrary".
    psum = pl.pallas_call(
        functools.partial(_ffm_pool_kernel, compute_dtype),
        out_shape=jax.ShapeDtypeStruct((n_splits, N, 1, Cout), jnp.float32),
        grid=(n_splits, N, tiles1),
        in_specs=[
            pl.BlockSpec((1, t1, c_sp), lambda s, n, t: (n, s * tiles1 + t, 0)),
            pl.BlockSpec((1, t1, c_cp), lambda s, n, t: (n, s * tiles1 + t, 0)),
            pl.BlockSpec((c_sp, Cout), lambda s, n, t: (0, 0)),
            pl.BlockSpec((c_cp, Cout), lambda s, n, t: (0, 0)),
            pl.BlockSpec((1, Cout), lambda s, n, t: (0, 0)),
            pl.BlockSpec((1, Cout), lambda s, n, t: (0, 0)),
        ],
        out_specs=pl.BlockSpec((1, 1, 1, Cout), lambda s, n, t: (s, n, 0, 0)),
        compiler_params=pltpu.CompilerParams(
            dimension_semantics=("parallel", "parallel", "arbitrary"),
            **common_compiler),
    )(x_sp, x_cp, w0s, w0c, scale, shift)

    # Pass 2: combine partial pools + tiny SE matmuls in-kernel, recompute the
    # feat tile from the inputs (recompute is free while memory-bound) and
    # apply the attention. Fully parallel grid.
    out = pl.pallas_call(
        functools.partial(_ffm_recompute_apply_kernel, 1.0 / HW, compute_dtype),
        out_shape=jax.ShapeDtypeStruct((N, HW, Cout), out_dtype),
        grid=(N, tiles2),
        in_specs=[
            pl.BlockSpec((1, t2, c_sp), lambda n, t: (n, t, 0)),
            pl.BlockSpec((1, t2, c_cp), lambda n, t: (n, t, 0)),
            pl.BlockSpec((c_sp, Cout), lambda n, t: (0, 0)),
            pl.BlockSpec((c_cp, Cout), lambda n, t: (0, 0)),
            pl.BlockSpec((1, Cout), lambda n, t: (0, 0)),
            pl.BlockSpec((1, Cout), lambda n, t: (0, 0)),
            pl.BlockSpec((Cout, Cmid), lambda n, t: (0, 0)),
            pl.BlockSpec((Cmid, Cout), lambda n, t: (0, 0)),
            pl.BlockSpec((n_splits, 1, 1, Cout), lambda n, t: (0, n, 0, 0)),
        ],
        out_specs=pl.BlockSpec((1, t2, Cout), lambda n, t: (n, t, 0)),
        compiler_params=pltpu.CompilerParams(
            dimension_semantics=("parallel", "parallel"), **common_compiler),
    )(x_sp, x_cp, w0s, w0c, scale, shift, w1f, w2f, psum)
    return out.reshape(N, H, W, Cout)


# ---------------------------------------------------------------------------
# Params / reference
# ---------------------------------------------------------------------------

def init_params(key, c_sp, c_cp, out_chan):
    """kaiming_normal_(a=1) on the 1x1 convs + fresh eval-mode BatchNorm fold."""
    in_chan = c_sp + c_cp
    k0, k1, k2 = jax.random.split(key, 3)
    cmid = out_chan // 4

    def kaiming(k, fan_in, fan_out):
        std = 1.0 / jnp.sqrt(jnp.float32(fan_in))   # gain(leaky_relu, a=1) = 1
        return jax.random.normal(k, (fan_in, fan_out), dtype=jnp.float32) * std

    w0 = kaiming(k0, in_chan, out_chan)          # convblk.conv (1x1) as (Cin, Cout)
    w0_sp, w0_cp = w0[:c_sp], w0[c_sp:]          # split so no runtime concat is needed
    w1 = kaiming(k1, out_chan, cmid)             # conv1
    w2 = kaiming(k2, cmid, out_chan)             # conv2

    gamma = jnp.ones((out_chan,), jnp.float32)
    beta = jnp.zeros((out_chan,), jnp.float32)
    running_mean = jnp.zeros((out_chan,), jnp.float32)
    running_var = jnp.ones((out_chan,), jnp.float32)
    eps = 1e-5
    bn_scale = gamma / jnp.sqrt(running_var + eps)
    bn_shift = beta - running_mean * bn_scale

    return (w0_sp, w0_cp, bn_scale, bn_shift, w1, w2)


def _reference(fsp, fcp, params, compute_dtype=jnp.bfloat16):
    """Pure-JAX reference (same bf16 input rounding as the kernel, f32 math)."""
    w0_sp, w0_cp, bn_scale, bn_shift, w1, w2 = params
    f32 = jnp.float32
    xs = fsp.astype(compute_dtype).astype(f32)
    xc = fcp.astype(compute_dtype).astype(f32)
    ws = w0_sp.astype(compute_dtype).astype(f32)
    wc = w0_cp.astype(compute_dtype).astype(f32)
    feat = jnp.einsum("nhwc,cd->nhwd", xs, ws) + jnp.einsum("nhwc,cd->nhwd", xc, wc)
    feat = jnp.maximum(feat * bn_scale + bn_shift, 0.0)
    pooled = jnp.mean(feat, axis=(1, 2))
    a = jnp.maximum(pooled @ w1, 0.0)
    atten = jax.nn.sigmoid(a @ w2)[:, None, None, :]
    return feat * atten + feat


if __name__ == "__main__":
    key = jax.random.PRNGKey(0)
    k_fsp, k_fcp, k_w = jax.random.split(key, 3)

    N, H, W = 2, 16, 16
    c_sp, c_cp = 64, 64                 # Cin = 128 -> lane-dense contraction
    out_chan = 128                      # Cout multiple of 128 -> unmasked stores

    fsp = jax.random.normal(k_fsp, (N, H, W, c_sp), dtype=jnp.float32)
    fcp = jax.random.normal(k_fcp, (N, H, W, c_cp), dtype=jnp.float32)
    params = init_params(k_w, c_sp, c_cp, out_chan)

    ref = _reference(fsp, fcp, params)

    # 1) Fused single-kernel path (whole image fits VMEM), f32 output.
    out_fused = jax.block_until_ready(
        feature_fusion_module(fsp, fcp, params, out_dtype=jnp.float32))
    assert out_fused.shape == (N, H, W, out_chan)
    assert jnp.allclose(out_fused, ref, atol=1e-2, rtol=2e-2), "fused path mismatch"

    # 2) HW-tiled two-pass path (pool-only pass 1, recompute+apply pass 2).
    out_tiled = jax.block_until_ready(
        feature_fusion_module(fsp, fcp, params, hw_tile=64, out_dtype=jnp.float32))
    assert out_tiled.shape == (N, H, W, out_chan)
    assert jnp.allclose(out_tiled, ref, atol=1e-2, rtol=2e-2), "tiled path mismatch"

    # 3) Small-batch core-split path (N=1, HW split in two for the v7x 2nd TC).
    out_split = jax.block_until_ready(
        feature_fusion_module(fsp[:1], fcp[:1], params, hw_tile=32, hw_splits=2,
                              out_dtype=jnp.float32))
    assert out_split.shape == (1, H, W, out_chan)
    assert jnp.allclose(out_split, ref[:1], atol=1e-2, rtol=2e-2), "split path mismatch"

    # 4) bf16 output stream (recommended when the consumer is bf16).
    out_bf16 = jax.block_until_ready(
        feature_fusion_module(fsp, fcp, params, out_dtype=jnp.bfloat16))
    assert out_bf16.dtype == jnp.bfloat16
    assert jnp.allclose(out_bf16.astype(jnp.float32), ref, atol=5e-2, rtol=5e-2), \
        "bf16-out path mismatch"

    print("KERNEL_OK")
</pallas_src>

<mosaic_0001>
module attributes {stable_mosaic.version = 11 : i64} {
  func.func @_ffm_fused_kernel(%arg0: i32, %arg1: memref<1x256x64xf32, #tpu.memory_space<vmem>>, %arg2: memref<1x256x64xf32, #tpu.memory_space<vmem>>, %arg3: memref<64x128xbf16, #tpu.memory_space<vmem>>, %arg4: memref<64x128xbf16, #tpu.memory_space<vmem>>, %arg5: memref<1x128xf32, #tpu.memory_space<vmem>>, %arg6: memref<1x128xf32, #tpu.memory_space<vmem>>, %arg7: memref<128x32xf32, #tpu.memory_space<vmem>>, %arg8: memref<32x128xf32, #tpu.memory_space<vmem>>, %arg9: memref<1x256x128xf32, #tpu.memory_space<vmem>>) attributes {dimension_semantics = [#tpu.dimension_semantics<parallel>], iteration_bounds = array<i64: 2>, scalar_prefetch = 0 : i64, scratch_operands = 0 : i64, tpu.core_type = #tpu.core_type<tc>, window_params = [{transform_indices = @transform_0, window_bounds = array<i64: 1, 256, 64>}, {transform_indices = @transform_1, window_bounds = array<i64: 1, 256, 64>}, {pipeline_mode = #tpu.pipeline_mode<synchronous>, transform_indices = @transform_2, window_bounds = array<i64: 64, 128>}, {pipeline_mode = #tpu.pipeline_mode<synchronous>, transform_indices = @transform_3, window_bounds = array<i64: 64, 128>}, {pipeline_mode = #tpu.pipeline_mode<synchronous>, transform_indices = @transform_4, window_bounds = array<i64: 1, 128>}, {pipeline_mode = #tpu.pipeline_mode<synchronous>, transform_indices = @transform_5, window_bounds = array<i64: 1, 128>}, {pipeline_mode = #tpu.pipeline_mode<synchronous>, transform_indices = @transform_6, window_bounds = array<i64: 128, 32>}, {pipeline_mode = #tpu.pipeline_mode<synchronous>, transform_indices = @transform_7, window_bounds = array<i64: 32, 128>}, {transform_indices = @transform_8, window_bounds = array<i64: 1, 256, 128>}]} {
    %c0 = arith.constant 0 : index
    %c0_0 = arith.constant 0 : index
    %c0_1 = arith.constant 0 : index
    %0 = vector.load %arg1[%c0, %c0_0, %c0_1] : memref<1x256x64xf32, #tpu.memory_space<vmem>>, vector<1x256x64xf32>
    %1 = vector.shape_cast %0 : vector<1x256x64xf32> to vector<256x64xf32>
    %2 = arith.truncf %1 : vector<256x64xf32> to vector<256x64xbf16>
    %c0_2 = arith.constant 0 : index
    %c0_3 = arith.constant 0 : index
    %c0_4 = arith.constant 0 : index
    %3 = vector.load %arg2[%c0_2, %c0_3, %c0_4] : memref<1x256x64xf32, #tpu.memory_space<vmem>>, vector<1x256x64xf32>
    %4 = vector.shape_cast %3 : vector<1x256x64xf32> to vector<256x64xf32>
    %5 = arith.truncf %4 : vector<256x64xf32> to vector<256x64xbf16>
    %c0_5 = arith.constant 0 : index
    %c0_6 = arith.constant 0 : index
    %6 = vector.load %arg3[%c0_5, %c0_6] : memref<64x128xbf16, #tpu.memory_space<vmem>>, vector<64x128xbf16>
    %cst = arith.constant dense<0.000000e+00> : vector<256x128xf32>
    %7 = tpu.matmul %2, %6, %cst {dimension_numbers = #tpu.dot_dimension_numbers<[1], [0], [0], [1], [0, 0, 1, 1], [], []>} : vector<256x64xbf16>, vector<64x128xbf16>, vector<256x128xf32> -> vector<256x128xf32>
    %c0_7 = arith.constant 0 : index
    %c0_8 = arith.constant 0 : index
    %8 = vector.load %arg4[%c0_7, %c0_8] : memref<64x128xbf16, #tpu.memory_space<vmem>>, vector<64x128xbf16>
    %cst_9 = arith.constant dense<0.000000e+00> : vector<256x128xf32>
    %9 = tpu.matmul %5, %8, %cst_9 {dimension_numbers = #tpu.dot_dimension_numbers<[1], [0], [0], [1], [0, 0, 1, 1], [], []>} : vector<256x64xbf16>, vector<64x128xbf16>, vector<256x128xf32> -> vector<256x128xf32>
    %10 = arith.addf %7, %9 : vector<256x128xf32>
    %c0_10 = arith.constant 0 : index
    %c0_11 = arith.constant 0 : index
    %11 = vector.load %arg5[%c0_10, %c0_11] : memref<1x128xf32, #tpu.memory_space<vmem>>, vector<1x128xf32>
    %12 = vector.broadcast %11 : vector<1x128xf32> to vector<256x128xf32>
    %13 = arith.mulf %10, %12 : vector<256x128xf32>
    %c0_12 = arith.constant 0 : index
    %c0_13 = arith.constant 0 : index
    %14 = vector.load %arg6[%c0_12, %c0_13] : memref<1x128xf32, #tpu.memory_space<vmem>>, vector<1x128xf32>
    %15 = vector.broadcast %14 : vector<1x128xf32> to vector<256x128xf32>
    %16 = arith.addf %13, %15 : vector<256x128xf32>
    %cst_14 = arith.constant 0.000000e+00 : f32
    %17 = vector.broadcast %cst_14 : f32 to vector<256x128xf32>
    %18 = arith.maximumf %16, %17 : vector<256x128xf32>
    %cst_15 = arith.constant dense<0.000000e+00> : vector<128xf32>
    %19 = vector.multi_reduction <add>, %18, %cst_15 [0] : vector<256x128xf32> to vector<128xf32>
    %20 = vector.shape_cast %19 : vector<128xf32> to vector<1x128xf32>
    %cst_16 = arith.constant 3.906250e-03 : f32
    %21 = vector.broadcast %cst_16 : f32 to vector<1x128xf32>
    %22 = arith.mulf %20, %21 : vector<1x128xf32>
    %c0_17 = arith.constant 0 : index
    %c0_18 = arith.constant 0 : index
    %23 = vector.load %arg7[%c0_17, %c0_18] : memref<128x32xf32, #tpu.memory_space<vmem>>, vector<128x32xf32>
    %cst_19 = arith.constant dense<0.000000e+00> : vector<1x32xf32>
    %24 = tpu.matmul %22, %23, %cst_19 {dimension_numbers = #tpu.dot_dimension_numbers<[1], [0], [0], [1], [0, 0, 1, 1], [], []>} : vector<1x128xf32>, vector<128x32xf32>, vector<1x32xf32> -> vector<1x32xf32>
    %cst_20 = arith.constant 0.000000e+00 : f32
    %25 = vector.broadcast %cst_20 : f32 to vector<1x32xf32>
    %26 = arith.maximumf %24, %25 : vector<1x32xf32>
    %c0_21 = arith.constant 0 : index
    %c0_22 = arith.constant 0 : index
    %27 = vector.load %arg8[%c0_21, %c0_22] : memref<32x128xf32, #tpu.memory_space<vmem>>, vector<32x128xf32>
    %cst_23 = arith.constant dense<0.000000e+00> : vector<1x128xf32>
    %28 = tpu.matmul %26, %27, %cst_23 {dimension_numbers = #tpu.dot_dimension_numbers<[1], [0], [0], [1], [0, 0, 1, 1], [], []>} : vector<1x32xf32>, vector<32x128xf32>, vector<1x128xf32> -> vector<1x128xf32>
    %29 = arith.negf %28 : vector<1x128xf32>
    %30 = math.exp %29 : vector<1x128xf32>
    %cst_24 = arith.constant 1.000000e+00 : f32
    %31 = vector.broadcast %cst_24 : f32 to vector<1x128xf32>
    %32 = arith.addf %31, %30 : vector<1x128xf32>
    %33 = arith.divf %31, %32 : vector<1x128xf32>
    %cst_25 = arith.constant 1.000000e+00 : f32
    %34 = vector.broadcast %cst_25 : f32 to vector<1x128xf32>
    %35 = arith.addf %33, %34 : vector<1x128xf32>
    %36 = vector.broadcast %35 : vector<1x128xf32> to vector<256x128xf32>
    %37 = arith.mulf %18, %36 : vector<256x128xf32>
    %c0_26 = arith.constant 0 : index
    %c0_27 = arith.constant 0 : index
    %c0_28 = arith.constant 0 : index
    %38 = vector.load %arg9[%c0_26, %c0_27, %c0_28] : memref<1x256x128xf32, #tpu.memory_space<vmem>>, vector<1x256x128xf32>
    %39 = vector.shape_cast %38 : vector<1x256x128xf32> to vector<256x128xf32>
    %40 = vector.shape_cast %37 : vector<256x128xf32> to vector<1x256x128xf32>
    tpu.vector_store %arg9[%c0_26, %c0_27, %c0_28], %40 {strides = array<i32>} : memref<1x256x128xf32, #tpu.memory_space<vmem>>, vector<1x256x128xf32>,
    return
  }
  func.func @transform_0(%arg0: i32) -> (i32, i32, i32) {
    %c0_i32 = arith.constant 0 : i32
    %c0_i32_0 = arith.constant 0 : i32
    %c0_i32_1 = arith.constant 0 : i32
    return %arg0, %c0_i32, %c0_i32_0 : i32, i32, i32
  }
  func.func @transform_1(%arg0: i32) -> (i32, i32, i32) {
    %c0_i32 = arith.constant 0 : i32
    %c0_i32_0 = arith.constant 0 : i32
    %c0_i32_1 = arith.constant 0 : i32
    return %arg0, %c0_i32, %c0_i32_0 : i32, i32, i32
  }
  func.func @transform_2(%arg0: i32) -> (i32, i32) {
    %c0_i32 = arith.constant 0 : i32
    %c0_i32_0 = arith.constant 0 : i32
    %c0_i32_1 = arith.constant 0 : i32
    return %c0_i32, %c0_i32_0 : i32, i32
  }
  func.func @transform_3(%arg0: i32) -> (i32, i32) {
    %c0_i32 = arith.constant 0 : i32
    %c0_i32_0 = arith.constant 0 : i32
    %c0_i32_1 = arith.constant 0 : i32
    return %c0_i32, %c0_i32_0 : i32, i32
  }
  func.func @transform_4(%arg0: i32) -> (i32, i32) {
    %c0_i32 = arith.constant 0 : i32
    %c0_i32_0 = arith.constant 0 : i32
    %c0_i32_1 = arith.constant 0 : i32
    return %c0_i32, %c0_i32_0 : i32, i32
  }
  func.func @transform_5(%arg0: i32) -> (i32, i32) {
    %c0_i32 = arith.constant 0 : i32
    %c0_i32_0 = arith.constant 0 : i32
    %c0_i32_1 = arith.constant 0 : i32
    return %c0_i32, %c0_i32_0 : i32, i32
  }
  func.func @transform_6(%arg0: i32) -> (i32, i32) {
    %c0_i32 = arith.constant 0 : i32
    %c0_i32_0 = arith.constant 0 : i32
    %c0_i32_1 = arith.constant 0 : i32
    return %c0_i32, %c0_i32_0 : i32, i32
  }
  func.func @transform_7(%arg0: i32) -> (i32, i32) {
    %c0_i32 = arith.constant 0 : i32
    %c0_i32_0 = arith.constant 0 : i32
    %c0_i32_1 = arith.constant 0 : i32
    return %c0_i32, %c0_i32_0 : i32, i32
  }
  func.func @transform_8(%arg0: i32) -> (i32, i32, i32) {
    %c0_i32 = arith.constant 0 : i32
    %c0_i32_0 = arith.constant 0 : i32
    %c0_i32_1 = arith.constant 0 : i32
    return %arg0, %c0_i32, %c0_i32_0 : i32, i32, i32
  }
}

</mosaic_0001>

<bundles_post_ra>
// kernel: tpu_custom_call.1
= control target key start
LH: loop header
LB: loop body
LE: loop exit
PB: predicated region body
PF: predicated region fallthrough
CT: control target
= control target key end

     0   :  { %13 = vsyncpa [#allocation3], 0  ;;  %s2595_s0 = inlined_call_operand.vmem [shape: f32[2,256,64], index: 0, kind: input, shape index: {}]   ;;  %s2596_s1 = inlined_call_operand.vmem [shape: f32[2,256,64], index: 1, kind: input, shape index: {}]   ;;  %s2597_s2 = inlined_call_operand.vmem [shape: bf16[64,128], index: 2, kind: input, shape index: {}]   ;;  %s2598_s3 = inlined_call_operand.vmem [shape: bf16[64,128], index: 3, kind: input, shape index: {}]   ;;  %s2599_s4 = inlined_call_operand.vmem [shape: f32[1,128], index: 4, kind: input, shape index: {}]   ;;  %s2600_s5 = inlined_call_operand.vmem [shape: f32[1,128], index: 5, kind: input, shape index: {}]   ;;  %s2601_s6 = inlined_call_operand.vmem [shape: f32[128,32], index: 6, kind: input, shape index: {}]   ;;  %s2602_s7 = inlined_call_operand.vmem [shape: f32[32,128], index: 7, kind: input, shape index: {}]   ;;  %s2603_s8 = inlined_call_operand.hbm [shape: f32[2,256,128], index: 8, kind: output, shape index: {}]  }
   0x1   :  { %15 = vsyncpa [#allocation3 + $0x1], 0  ;;  %s1870_s27 = smov 0   ;;  %s1872_s28 = smov 0  }
   0x2   :  { %s1874_s29 = smov 0   ;;  %s1876_s30 = smov 0  }
   0x3 LB: > { %s1891_s9 = sadd.s32 4294967295, %s1817_s30   ;;  %s1380_s10 = sadd.s32 4294967294, %s1817_s30   ;;  %s1817_s30 = sphi %s1876_s30, %s2639_s30   ;;  %s1813_s29 = sphi %s1874_s29, %s2638_s29   ;;  %s1809_s28 = sphi %s1872_s28, %s2637_s28   ;;  %s1805_s27 = sphi %s1870_s27, %s2636_s27  }
   0x4   : > { %s1895_s11 = sadd.s32 1, %s1817_s30   ;;  %s206_s12 = sadd.s32 1, %s1813_s29 }
   0x5   : > { %s203_s13 = ssub.s32 %s1817_s30, %s1895_s11  ;;  %p216_p0 = scmp.ne.s32.totalorder %s1813_s29, %s1809_s28 }
   0x6   : > { %p204_p1 = scmp.eq.s32.totalorder %s203_s13, 0  ;;  %p217_p2 = scmp.eq.s32.totalorder %s1891_s9, 1 }
   0x7   : > { %p222_p3 = scmp.ne.s32.totalorder %s1809_s28, %s1805_s27  ;;  %p223_p4 = scmp.eq.s32.totalorder %s1380_s10, 1 }
   0x8   : > { %s1906_s14 = scalar_select %p204_p1, %s1813_s29, %s206_s12  }
   0x9   : > { %p1908_p5 = por %p217_p2, %p216_p0  ;;  %p1912_p6 = por %p223_p4, %p222_p3 }
   0xa   : > { %p1383_p7 = scmp.ge.s32.totalorder %s1817_s30, 1  ;;  %p275_p8 = scmp.lt.s32.totalorder %s1817_s30, 3 }
   0xc   : > { %p276_p9 = pnand %p1383_p7, %p275_p8 }
   0xd   : > { %v1743_v0 = vld [vmem:[%s2598_s3] sm:$0xff] (!%p276_p9)   ;;  %p314_p10 = scmp.lt.s32.totalorder (!%p276_p9), %s1891_s9, 1  ;;  %v1744_v1 = vld [vmem:[%s2598_s3 + $0x8] sm:$0xff] (!%p276_p9)   ;;  %v1745_v3 = vld [vmem:[%s2598_s3 + $0x10] sm:$0xff] (!%p276_p9)   ;;  %vm461_vm0 = vcmask (!%p276_p9), 523264   ;;  %vm1820_vm1 = vmmov (!%p276_p9), 0  }
   0xe   : > { %279 = sbr.rel (%p276_p9) target bundleno = 880 (0x370), region = 52  ;;  %1503 = vmatprep.subr.bf16.mxu0 (!%p276_p9), %v1743_v0  ;;  %v1746_v2 = vld [vmem:[%s2597_s2] sm:$0xff] (!%p276_p9)   ;;  %v1748_v4 = vld [vmem:[%s2597_s2 + $0x8] sm:$0xff] (!%p276_p9)   ;;  %v1747_v7 = vld [vmem:[%s2598_s3 + $0x18] sm:$0xff] (!%p276_p9)   ;;  %vm1143_vm2 = vcmask (!%p276_p9), 261120   ;;  %s311_s20 = sand.u32 (!%p276_p9), 1, %s1809_s28  }
   0xf   : > { %1504 = vmatpush3.bf16.msra.mxu0 (!%p276_p9), %v1743_v0  ;;  %1659 = vmatprep.subr.bf16.mxu1 (!%p276_p9), %v1746_v2  ;;  %v1749_v9 = vld [vmem:[%s2597_s2 + $0x10] sm:$0xff] (!%p276_p9)   ;;  %v1750_v14 = vld [vmem:[%s2597_s2 + $0x18] sm:$0xff] (!%p276_p9)   ;;  %s2554_s10 = scalar_lea.sflag (!%p276_p9), [#allocation3], %s311_s20  ;;  %s1822_s13 = smov (!%p276_p9), [#allocation2]  }
  0x10   : > { %1505 = vmatprep.subr.bf16.mxu0 (!%p276_p9), %v1744_v1  ;;  %1663 = vmatpush3.bf16.msra.mxu1 (!%p276_p9), %v1746_v2  ;;  %s1759_s17 = sshll.u32 (!%p276_p9), %s1822_s13, 4  ;;  %s1760_s17 = int_to_ptr.vmem [resolvable:$false] %s1759_s17 }
  0x11   : > { %1660 = vmatprep.subr.bf16.mxu1 (!%p276_p9), %v1748_v4 }
  0x13   : > { %1506 = vmatpush3.bf16.msra.mxu0 (!%p276_p9), %v1744_v1 }
  0x14   : > { %1507 = vmatprep.subr.bf16.mxu0 (!%p276_p9), %v1745_v3  ;;  %1664 = vmatpush3.bf16.msra.mxu1 (!%p276_p9), %v1748_v4 }
  0x15   : > { %s315_s21 = scalar_select %p314_p10, %s1891_s9, 1  ;;  %1661 = vmatprep.subr.bf16.mxu1 %v1749_v9 }
  0x17   : > { %s1438_s26 = sshll.u32 %s315_s21, 8  ;;  %1508 = vmatpush3.bf16.msra.mxu0 %v1745_v3  ;;  %s1384_s21 = sshll.u32 %s311_s20, 8 }
  0x18   : > { %s1938_s18 = scalar_lea.vmem %s2596_s1, %s1438_s26  ;;  %s1948_s23 = scalar_lea.vmem %s2595_s0, %s1438_s26  ;;  %1509 = vmatprep.subr.bf16.mxu0 %v1747_v7  ;;  %1665 = vmatpush3.bf16.msra.mxu1 %v1749_v9 }
  0x19   : > { %v373_v5 = vld [vmem:[%s1938_s18] sm:$0xff]  ;;  %v374_v6 = vld [vmem:[%s1938_s18 + $0x8] sm:$0xff]  ;;  %v375_v12 = vld [vmem:[%s1938_s18 + $0x10] sm:$0xff]  ;;  %1662 = vmatprep.subr.bf16.mxu1 %v1750_v14  ;;  %s2469_s22 = scalar_lea.vmem [#allocation2], %s1384_s21 }
  0x1a   : > { %v405_v8 = vpack.c.bf16 %v374_v6, %v373_v5  ;;  %v329_v10 = vld [vmem:[%s1948_s23 + $0x20] sm:$0xff]  ;;  %v330_v11 = vld [vmem:[%s1948_s23 + $0x28] sm:$0xff]  ;;  %v376_v13 = vld [vmem:[%s1938_s18 + $0x18] sm:$0xff]  ;;  %s1306_s24 = sshll.u32 %s2469_s22, 4  ;;  %s2530_s24 = int_to_ptr.vmem [resolvable:$true] %s1306_s24 }
  0x1b   : > { %v359_v15 = vpack.c.bf16 %v330_v11, %v329_v10  ;;  %v377_v16 = vld [vmem:[%s1938_s18 + $0x20] sm:$0xff]  ;;  %v378_v17 = vld [vmem:[%s1938_s18 + $0x28] sm:$0xff]  ;;  %v406_v18 = vpack.c.bf16 %v376_v13, %v375_v12  ;;  %v331_v19 = vld [vmem:[%s1948_s23 + $0x30] sm:$0xff]  ;;  %1510 = vmatpush3.bf16.msra.mxu0 %v1747_v7  ;;  %s1755_s12 = scalar_lea.vmem %s2530_s24, 4096  ;;  %p1762_p0 = scmp.lt.s32.totalorder %s2530_s24, %s1760_s17 }
  0x1c   : > { %1511 = vmatprep.mubr.msk.bf16.mxu0 %vm461_vm0, %v405_v8  ;;  %v332_v20 = vld [vmem:[%s1948_s23 + $0x38] sm:$0xff]  ;;  %v407_v21 = vpack.c.bf16 %v378_v17, %v377_v16  ;;  %v333_v22 = vld [vmem:[%s1948_s23 + $0x40] sm:$0xff]  ;;  %v334_v23 = vld [vmem:[%s1948_s23 + $0x48] sm:$0xff]  ;;  %1543 = vmatprep.subr.bf16.mxu0 %v1746_v2  ;;  %p1756_p11 = scmp.ne.s32.totalorder %s2530_s24, %s1755_s12 }
  0x1d   : > { %1555 = vmatprep.mubr.msk.bf16.mxu1 %vm461_vm0, %v359_v15  ;;  %v360_v24 = vpack.c.bf16 %v332_v20, %v331_v19  ;;  %1666 = vmatpush3.bf16.msra.mxu1 %v1750_v14  ;;  %v361_v25 = vpack.c.bf16 %v334_v23, %v333_v22  ;;  %v379_v26 = vld [vmem:[%s1938_s18 + $0x30] sm:$0xff]  ;;  %v380_v27 = vld [vmem:[%s1938_s18 + $0x38] sm:$0xff]  ;;  %v381_v28 = vld [vmem:[%s1938_s18 + $0x40] sm:$0xff] }
  0x1e   : > { %1512 = vmatmul.mubr.msk.bf16.vlgmr.msra.gmra.mrb[0].mxu0 %vm461_vm0, %v406_v18  ;;  %v382_v29 = vld [vmem:[%s1938_s18 + $0x48] sm:$0xff]  ;;  %v408_v30 = vpack.c.bf16 %v380_v27, %v379_v26  ;;  %v335_v31 = vld [vmem:[%s1948_s23 + $0x50] sm:$0xff]  ;;  %v336_v32 = vld [vmem:[%s1948_s23 + $0x58] sm:$0xff]  ;;  %p1757_p12 = pnand %p1756_p11, %p1908_p5 }
  0x1f   : > { %1544 = vmatpush3.bf16.msra.mxu0 %v1746_v2  ;;  %1515 = vmatprep.mubr.msk.bf16.mxu0 %vm461_vm0, %v407_v21  ;;  %v409_v33 = vpack.c.bf16 %v382_v29, %v381_v28  ;;  %v337_v34 = vld [vmem:[%s1948_s23 + $0x60] sm:$0xff]  ;;  %v338_v35 = vld [vmem:[%s1948_s23 + $0x68] sm:$0xff]  ;;  %v362_v36 = vpack.c.bf16 %v336_v32, %v335_v31  ;;  %v383_v38 = vld [vmem:[%s1938_s18 + $0x50] sm:$0xff] }
  0x20   : > { %1545 = vmatprep.subr.bf16.mxu0 %v1748_v4  ;;  %1556 = vmatmul.mubr.msk.bf16.vlgmr.msra.gmra.mrb[0].mxu1 %vm461_vm0, %v360_v24  ;;  %v363_v37 = vpack.c.bf16 %v338_v35, %v337_v34  ;;  %v384_v39 = vld [vmem:[%s1938_s18 + $0x58] sm:$0xff]  ;;  %v385_v40 = vld [vmem:[%s1938_s18 + $0x60] sm:$0xff]  ;;  %v386_v41 = vld [vmem:[%s1938_s18 + $0x68] sm:$0xff]  ;;  %p1758_p13 = pneg %p1757_p12 }
  0x21   : > { %1559 = vmatprep.mubr.msk.bf16.mxu1 %vm461_vm0, %v361_v25  ;;  %v410_v42 = vpack.c.bf16 %v384_v39, %v383_v38  ;;  %v339_v43 = vld [vmem:[%s1948_s23 + $0x70] sm:$0xff]  ;;  %v340_v44 = vld [vmem:[%s1948_s23 + $0x78] sm:$0xff]  ;;  %v411_v45 = vpack.c.bf16 %v386_v41, %v385_v40  ;;  %v341_v46 = vld [vmem:[%s1948_s23 + $0x80] sm:$0xff] }
  0x22   : > { %v342_v47 = vld [vmem:[%s1948_s23 + $0x88] sm:$0xff]  ;;  %v364_v48 = vpack.c.bf16 %v340_v44, %v339_v43  ;;  %v387_v50 = vld [vmem:[%s1938_s18 + $0x70] sm:$0xff]  ;;  %v388_v51 = vld [vmem:[%s1938_s18 + $0x78] sm:$0xff]  ;;  %v1819_v43 = vmov 0.0|0.0  }
  0x23   : > { %1546 = vmatpush3.bf16.msra.mxu0 %v1748_v4  ;;  %v365_v49 = vpack.c.bf16 %v342_v47, %v341_v46  ;;  %v389_v52 = vld [vmem:[%s1938_s18 + $0x80] sm:$0xff]  ;;  %v390_v53 = vld [vmem:[%s1938_s18 + $0x88] sm:$0xff]  ;;  %v412_v54 = vpack.c.bf16 %v388_v51, %v387_v50  ;;  %v343_v55 = vld [vmem:[%s1948_s23 + $0x90] sm:$0xff]  ;;  %1629 = vmatprep.subr.bf16.mxu1 %v1819_v43  ;;  %v1821_v46 = vmov 0.0  }
  0x24   : > { %1547 = vmatprep.subr.bf16.mxu0 %v1749_v9  ;;  %v344_v56 = vld [vmem:[%s1948_s23 + $0x98] sm:$0xff]  ;;  %v413_v57 = vpack.c.bf16 %v390_v53, %v389_v52  ;;  %v345_v58 = vld [vmem:[%s1948_s23 + $0xa0] sm:$0xff]  ;;  %v346_v59 = vld [vmem:[%s1948_s23 + $0xa8] sm:$0xff] }
  0x25   : > { %v366_v60 = vpack.c.bf16 %v344_v56, %v343_v55  ;;  %v367_v61 = vpack.c.bf16 %v346_v59, %v345_v58  ;;  %v391_v62 = vld [vmem:[%s1938_s18 + $0x90] sm:$0xff]  ;;  %v392_v63 = vld [vmem:[%s1938_s18 + $0x98] sm:$0xff]  ;;  %v393_v0 = vld [vmem:[%s1938_s18 + $0xa0] sm:$0xff] }
  0x26   : > { %1516 = vmatmul.mubr.msk.bf16.gmra.mrb[4].mxu0 %vm461_vm0, %v408_v30  ;;  %v394_v1 = vld [vmem:[%s1938_s18 + $0xa8] sm:$0xff]  ;;  %v414_v2 = vpack.c.bf16 %v392_v63, %v391_v62  ;;  %v347_v3 = vld [vmem:[%s1948_s23 + $0xb0] sm:$0xff]  ;;  %v348_v4 = vld [vmem:[%s1948_s23 + $0xb8] sm:$0xff] }
  0x27   : > { %1519 = vmatprep.mubr.msk.bf16.mxu0 %vm461_vm0, %v409_v33  ;;  %1548 = vmatpush3.bf16.msra.mxu0 %v1749_v9  ;;  %v415_v5 = vpack.c.bf16 %v394_v1, %v393_v0  ;;  %v349_v6 = vld [vmem:[%s1948_s23 + $0xc0] sm:$0xff]  ;;  %v350_v7 = vld [vmem:[%s1948_s23 + $0xc8] sm:$0xff]  ;;  %v368_v8 = vpack.c.bf16 %v348_v4, %v347_v3  ;;  %v395_v10 = vld [vmem:[%s1938_s18 + $0xb0] sm:$0xff] }
  0x28   : > { %1549 = vmatprep.subr.bf16.mxu0 %v1750_v14  ;;  %1560 = vmatmul.mubr.msk.bf16.gmra.mrb[4].mxu1 %vm461_vm0, %v362_v36  ;;  %v369_v9 = vpack.c.bf16 %v350_v7, %v349_v6  ;;  %v396_v11 = vld [vmem:[%s1938_s18 + $0xb8] sm:$0xff]  ;;  %v397_v12 = vld [vmem:[%s1938_s18 + $0xc0] sm:$0xff]  ;;  %v398_v13 = vld [vmem:[%s1938_s18 + $0xc8] sm:$0xff] }
  0x29   : > { %1563 = vmatprep.mubr.msk.bf16.mxu1 %vm461_vm0, %v363_v37  ;;  %v351_v15 = vld [vmem:[%s1948_s23 + $0xd0] sm:$0xff]  ;;  %v352_v16 = vld [vmem:[%s1948_s23 + $0xd8] sm:$0xff]  ;;  %v417_v17 = vpack.c.bf16 %v398_v13, %v397_v12  ;;  %v353_v18 = vld [vmem:[%s1948_s23 + $0xe0] sm:$0xff] }
  0x2a   : > { %v354_v19 = vld [vmem:[%s1948_s23 + $0xe8] sm:$0xff]  ;;  %v370_v20 = vpack.c.bf16 %v352_v16, %v351_v15  ;;  %v399_v22 = vld [vmem:[%s1938_s18 + $0xd0] sm:$0xff]  ;;  %v400_v23 = vld [vmem:[%s1938_s18 + $0xd8] sm:$0xff] }
  0x2b   : > { %1550 = vmatpush3.bf16.msra.mxu0 %v1750_v14  ;;  %v416_v14 = vpack.c.bf16 %v396_v11, %v395_v10  ;;  %v371_v21 = vpack.c.bf16 %v354_v19, %v353_v18  ;;  %v401_v24 = vld [vmem:[%s1938_s18 + $0xe0] sm:$0xff]  ;;  %v402_v25 = vld [vmem:[%s1938_s18 + $0xe8] sm:$0xff]  ;;  %v418_v26 = vpack.c.bf16 %v400_v23, %v399_v22  ;;  %v355_v27 = vld [vmem:[%s1948_s23 + $0xf0] sm:$0xff] }
  0x2c   : > { %v356_v28 = vld [vmem:[%s1948_s23 + $0xf8] sm:$0xff]  ;;  %v419_v29 = vpack.c.bf16 %v402_v25, %v401_v24  ;;  %v403_v31 = vld [vmem:[%s1938_s18 + $0xf0] sm:$0xff]  ;;  %v325_v33 = vld [vmem:[%s1948_s23] sm:$0xff] }
  0x2d   : > { %v372_v30 = vpack.c.bf16 %v356_v28, %v355_v27  ;;  %v404_v32 = vld [vmem:[%s1938_s18 + $0xf8] sm:$0xff]  ;;  %v326_v34 = vld [vmem:[%s1948_s23 + $0x8] sm:$0xff]  ;;  %v327_v37 = vld [vmem:[%s1948_s23 + $0x10] sm:$0xff]  ;;  %s1761_s18 = scalar_lea.vmem %s1760_s17, 8192 }
  0x2e   : > { %1520 = vmatmul.mubr.msk.bf16.gmra.mrb[8].mxu0 %vm461_vm0, %v410_v42  ;;  %v420_v35 = vpack.c.bf16 %v404_v32, %v403_v31  ;;  %v357_v36 = vpack.c.bf16 %v326_v34, %v325_v33  ;;  %v328_v38 = vld [vmem:[%s1948_s23 + $0x18] sm:$0xff]  ;;  %v1052_v40 = vld [vmem:[%s2601_s6] sm:$0xff]  ;;  %v1053_v41 = vld [vmem:[%s2601_s6 + $0x8] sm:$0xff]  ;;  %s1440_s23 = sshll.u32 %s1891_s9, 12  ;;  %p1763_p1 = scmp.lt.s32.totalorder %s1761_s18, %s1755_s12 }
  0x2f   : > { %1523 = vmatprep.mubr.msk.bf16.mxu0 %vm461_vm0, %v411_v45  ;;  %v358_v39 = vpack.c.bf16 %v328_v38, %v327_v37  ;;  %v1054_v42 = vld [vmem:[%s2601_s6 + $0x10] sm:$0xff]  ;;  %v1630_v44 = vpack.c.bf16 %v1053_v41, %v1052_v40  ;;  %v1055_v45 = vld [vmem:[%s2601_s6 + $0x18] sm:$0xff]  ;;  %v1061_v55 = vld [vmem:[%s2601_s6 + $0x48] sm:$0xff]  ;;  %s2528_s26 = scalar_lea.hbm %s2603_s8, %s1440_s23 }
  0x30   : > { %1564 = vmatmul.mubr.msk.bf16.gmra.mrb[8].mxu1 %vm461_vm0, %v364_v48  ;;  %v1633_v47 = vpack.c.bf16 %v1055_v45, %v1054_v42  ;;  %v1056_v48 = vld [vmem:[%s2601_s6 + $0x20] sm:$0xff]  ;;  %v1058_v51 = vld [vmem:[%s2601_s6 + $0x30] sm:$0xff]  ;;  %v1059_v52 = vld [vmem:[%s2601_s6 + $0x38] sm:$0xff]  ;;  %p1764_p2 = por %p1763_p1, %p1762_p0 }
  0x31   : > { %1567 = vmatprep.mubr.msk.bf16.mxu1 %vm461_vm0, %v365_v49  ;;  %1631 = vmatpush3.bf16.msra.mxu1 %v1630_v44  ;;  %v1057_v49 = vld [vmem:[%s2601_s6 + $0x28] sm:$0xff]  ;;  %v1639_v53 = vpack.c.bf16 %v1059_v52, %v1058_v51  ;;  %v1063_v58 = vld [vmem:[%s2601_s6 + $0x58] sm:$0xff]  ;;  %v1066_v3 = vld [vmem:[%s2601_s6 + $0x70] sm:$0xff] }
  0x32   : > { %1632 = vmatprep.subr.bf16.mxu1 %v1819_v43  ;;  %v1636_v50 = vpack.c.bf16 %v1057_v49, %v1056_v48  ;;  %v1067_v4 = vld [vmem:[%s2601_s6 + $0x78] sm:$0xff]  ;;  %p1765_p3 = pnand %p1764_p2, %p1758_p13 }
  0x35   : > { %1634 = vmatpush3.bf16.msra.mxu1 %v1633_v47 }
  0x36   : > { %1524 = vmatmul.mubr.msk.bf16.gmra.mrb[12].mxu0 %vm461_vm0, %v412_v54  ;;  %1635 = vmatprep.subr.bf16.mxu1 %v1819_v43  ;;  %v1060_v54 = vld [vmem:[%s2601_s6 + $0x40] sm:$0xff] }
  0x37   : > { %1527 = vmatprep.mubr.msk.bf16.mxu0 %vm461_vm0, %v413_v57  ;;  %v1642_v56 = vpack.c.bf16 %v1061_v55, %v1060_v54  ;;  %v1062_v57 = vld [vmem:[%s2601_s6 + $0x50] sm:$0xff] }
  0x38   : > { %1568 = vmatmul.mubr.msk.bf16.gmra.mrb[12].mxu1 %vm461_vm0, %v366_v60  ;;  %v1645_v59 = vpack.c.bf16 %v1063_v58, %v1062_v57  ;;  %v1064_v60 = vld [vmem:[%s2601_s6 + $0x60] sm:$0xff] }
  0x39   : > { %1571 = vmatprep.mubr.msk.bf16.mxu1 %vm461_vm0, %v367_v61  ;;  %1637 = vmatpush3.bf16.msra.mxu1 %v1636_v50  ;;  %v1065_v61 = vld [vmem:[%s2601_s6 + $0x68] sm:$0xff] }
  0x3a   : > { %1638 = vmatprep.subr.bf16.mxu1 %v1819_v43  ;;  %v1648_v1 = vpack.c.bf16 %v1065_v61, %v1064_v60 }
  0x3d   : > { %1640 = vmatpush3.bf16.msra.mxu1 %v1639_v53 }
  0x3e   : > { %1528 = vmatmul.mubr.msk.bf16.gmra.mrb[16].mxu0 %vm461_vm0, %v414_v2  ;;  %1641 = vmatprep.subr.bf16.mxu1 %v1819_v43 }
  0x3f   : > { %1531 = vmatprep.mubr.msk.bf16.mxu0 %vm461_vm0, %v415_v5 }
  0x40   : > { %1572 = vmatmul.mubr.msk.bf16.gmra.mrb[16].mxu1 %vm461_vm0, %v368_v8  ;;  %v1651_v8 = vpack.c.bf16 %v1067_v4, %v1066_v3 }
  0x41   : > { %1575 = vmatprep.mubr.msk.bf16.mxu1 %vm461_vm0, %v369_v9  ;;  %1643 = vmatpush3.bf16.msra.mxu1 %v1642_v56 }
  0x42   : > { %1644 = vmatprep.subr.bf16.mxu1 %v1819_v43 }
  0x45   : > { %1646 = vmatpush3.bf16.msra.mxu1 %v1645_v59 }
  0x46   : > { %1532 = vmatmul.mubr.msk.bf16.gmra.mrb[20].mxu0 %vm461_vm0, %v416_v14  ;;  %1647 = vmatprep.subr.bf16.mxu1 %v1819_v43 }
  0x47   : > { %1535 = vmatprep.mubr.msk.bf16.mxu0 %vm461_vm0, %v417_v17 }
  0x48   : > { %1576 = vmatmul.mubr.msk.bf16.gmra.mrb[20].mxu1 %vm461_vm0, %v370_v20 }
  0x49   : > { %1579 = vmatprep.mubr.msk.bf16.mxu1 %vm461_vm0, %v371_v21  ;;  %1649 = vmatpush3.bf16.msra.mxu1 %v1648_v1 }
  0x4a   : > { %1650 = vmatprep.subr.bf16.mxu1 %v1819_v43 }
  0x4d   : > { %1652 = vmatpush3.bf16.msra.mxu1 %v1651_v8 }
  0x4e   : > { %1536 = vmatmul.mubr.msk.bf16.gmra.mrb[24].mxu0 %vm461_vm0, %v418_v26  ;;  %1653 = vmatprep.subr.bf16.mxu1 %v1819_v43 }
  0x4f   : > { %1539 = vmatprep.mubr.msk.bf16.mxu0 %vm461_vm0, %v419_v29 }
  0x50   : > { %1580 = vmatmul.mubr.msk.bf16.gmra.mrb[24].mxu1 %vm461_vm0, %v372_v30 }
  0x51   : > { %1615 = vmatprep.mubr.msk.f32.mxu1 %vm1820_vm1, %v1821_v46 }
  0x56   : > { %1540 = vmatmul.mubr.msk.bf16.gmra.mrb[28].mxu0 %vm461_vm0, %v420_v35 }
  0x57   : > { %1551 = vmatprep.mubr.msk.bf16.mxu0 %vm461_vm0, %v357_v36 }
  0x5e   : > { %1552 = vmatmul.mubr.msk.bf16.vlgmr.msra.gmra.mrb[0].mxu0 %vm461_vm0, %v358_v39 }
  0xf3   : > { %v1557_v62 = vpop.f32.mrb[0].mxu1 }
  0xf4   : > { %v793_v63 = vpop.f32.mrb[1].mxu1 }
  0xf5   : > { %v1558_v0 = vpop.f32.mrb[2].mxu1 }
  0xf6   : > { %v796_v2 = vpop.f32.mrb[3].mxu1 }
  0xf9   : > { %v1517_v5 = vpop.f32.mrb[4].mxu0 }
  0xfa   : > { %v2107_v6 = vadd.f32 %v1557_v62, %v1517_v5  ;;  %v560_v7 = vpop.f32.mrb[5].mxu0 }
  0xfb   : > { %v2109_v9 = vadd.f32 %v793_v63, %v560_v7  ;;  %v1518_v10 = vpop.f32.mrb[6].mxu0  ;;  %v1561_v13 = vpop.f32.mrb[4].mxu1 }
  0xfc   : > { %v2112_v11 = vadd.f32 %v1558_v0, %v1518_v10  ;;  %v563_v12 = vpop.f32.mrb[7].mxu0  ;;  %v809_v15 = vpop.f32.mrb[5].mxu1 }
  0xfd   : > { %v2114_v14 = vadd.f32 %v796_v2, %v563_v12  ;;  %v1562_v16 = vpop.f32.mrb[6].mxu1 }
  0xfe   : > { %v812_v17 = vpop.f32.mrb[7].mxu1 }
 0x101   : > { %v1521_v18 = vpop.f32.mrb[8].mxu0 }
 0x102   : > { %v2117_v19 = vadd.f32 %v1561_v13, %v1521_v18  ;;  %v576_v20 = vpop.f32.mrb[9].mxu0 }
 0x103   : > { %v2119_v21 = vadd.f32 %v809_v15, %v576_v20  ;;  %v1522_v22 = vpop.f32.mrb[10].mxu0  ;;  %v1565_v25 = vpop.f32.mrb[8].mxu1 }
 0x104   : > { %v2121_v23 = vadd.f32 %v1562_v16, %v1522_v22  ;;  %v579_v24 = vpop.f32.mrb[11].mxu0  ;;  %v825_v27 = vpop.f32.mrb[9].mxu1 }
 0x105   : > { %v2123_v26 = vadd.f32 %v812_v17, %v579_v24  ;;  %v1566_v28 = vpop.f32.mrb[10].mxu1 }
 0x106   : > { %v828_v29 = vpop.f32.mrb[11].mxu1 }
 0x109   : > { %v1525_v30 = vpop.f32.mrb[12].mxu0 }
 0x10a   : > { %v2125_v31 = vadd.f32 %v1565_v25, %v1525_v30  ;;  %v592_v32 = vpop.f32.mrb[13].mxu0 }
 0x10b   : > { %v2127_v33 = vadd.f32 %v825_v27, %v592_v32  ;;  %v1526_v34 = vpop.f32.mrb[14].mxu0  ;;  %v1569_v37 = vpop.f32.mrb[12].mxu1 }
 0x10c   : > { %v2129_v35 = vadd.f32 %v1566_v28, %v1526_v34  ;;  %v595_v36 = vpop.f32.mrb[15].mxu0  ;;  %v841_v39 = vpop.f32.mrb[13].mxu1 }
 0x10d   : > { %v2131_v38 = vadd.f32 %v828_v29, %v595_v36  ;;  %v1570_v40 = vpop.f32.mrb[14].mxu1  ;;  %v2168_v36 = vld [vmem:[%s2599_s4] ss:$0 sm:$0xff] }
 0x10e   : > { %v844_v41 = vpop.f32.mrb[15].mxu1 }
 0x111   : > { %v1529_v42 = vpop.f32.mrb[16].mxu0 }
 0x112   : > { %v2133_v44 = vadd.f32 %v1569_v37, %v1529_v42  ;;  %v608_v45 = vpop.f32.mrb[17].mxu0  ;;  %v2175_v42 = vld [vmem:[%s2600_s5] ss:$0 sm:$0xff] }
 0x113   : > { %v2135_v47 = vadd.f32 %v841_v39, %v608_v45  ;;  %v1530_v48 = vpop.f32.mrb[18].mxu0  ;;  %v1573_v51 = vpop.f32.mrb[16].mxu1 }
 0x114   : > { %v2137_v49 = vadd.f32 %v1570_v40, %v1530_v48  ;;  %v611_v50 = vpop.f32.mrb[19].mxu0  ;;  %v857_v53 = vpop.f32.mrb[17].mxu1 }
 0x115   : > { %v2139_v52 = vadd.f32 %v844_v41, %v611_v50  ;;  %v1574_v54 = vpop.f32.mrb[18].mxu1 }
 0x116   : > { %v860_v55 = vpop.f32.mrb[19].mxu1 }
 0x119   : > { %v1533_v56 = vpop.f32.mrb[20].mxu0 }
 0x11a   : > { %v2141_v57 = vadd.f32 %v1573_v51, %v1533_v56  ;;  %v624_v58 = vpop.f32.mrb[21].mxu0  ;;  %v916_v56 = vmul.f32 %v2168_v36, %v2114_v14 }
 0x11b   : > { %v2143_v59 = vadd.f32 %v857_v53, %v624_v58  ;;  %v1534_v60 = vpop.f32.mrb[22].mxu0  ;;  %v1577_v63 = vpop.f32.mrb[20].mxu1  ;;  %v915_v53 = vmul.f32 %v2168_v36, %v2109_v9 }
 0x11c   : > { %v2145_v61 = vadd.f32 %v1574_v54, %v1534_v60  ;;  %v627_v62 = vpop.f32.mrb[23].mxu0  ;;  %v873_v1 = vpop.f32.mrb[21].mxu1 }
 0x11d   : > { %v2147_v0 = vadd.f32 %v860_v55, %v627_v62  ;;  %v1578_v2 = vpop.f32.mrb[22].mxu1  ;;  %v2200_v9 = vadd.f32 %v2175_v42, %v915_v53 }
 0x11e   : > { %v876_v3 = vpop.f32.mrb[23].mxu1 }
 0x121   : > { %v1537_v4 = vpop.f32.mrb[24].mxu0 }
 0x122   : > { %v2149_v5 = vadd.f32 %v1577_v63, %v1537_v4  ;;  %v640_v7 = vpop.f32.mrb[25].mxu0  ;;  %v917_v63 = vmul.f32 %v2168_v36, %v2107_v6 }
 0x123   : > { %v2151_v8 = vadd.f32 %v873_v1, %v640_v7  ;;  %v1538_v10 = vpop.f32.mrb[26].mxu0  ;;  %v1581_v15 = vpop.f32.mrb[24].mxu1 }
 0x124   : > { %v2153_v12 = vadd.f32 %v1578_v2, %v1538_v10  ;;  %v643_v13 = vpop.f32.mrb[27].mxu0  ;;  %v889_v17 = vpop.f32.mrb[25].mxu1  ;;  %v918_v2 = vmul.f32 %v2168_v36, %v2112_v11  ;;  %v2216_v7 = vadd.f32 %v2175_v42, %v917_v63  ;;  %v986_v10 = vmax.f32 %v2200_v9, 0.0 }
 0x125   : > { %v2155_v16 = vadd.f32 %v876_v3, %v643_v13  ;;  %v1582_v18 = vpop.f32.mrb[26].mxu1  ;;  %v2210_v3 = vadd.f32 %v2175_v42, %v916_v56  ;;  %v919_v13 = vmul.f32 %v2168_v36, %v2119_v21  ;;  %v925_v56 = vmul.f32 %v2168_v36, %v2125_v31 }
 0x126   : > { %v892_v20 = vpop.f32.mrb[27].mxu1  ;;  %v2224_v11 = vadd.f32 %v2175_v42, %v918_v2  ;;  %v926_v2 = vmul.f32 %v2168_v36, %v2129_v35 }
 0x127   : > { %v2235_v21 = vadd.f32 %v2175_v42, %v919_v13  ;;  %v2280_v13 = vadd.f32 %v2175_v42, %v925_v56 }
 0x129   : > { %v1541_v22 = vpop.f32.mrb[28].mxu0 }
 0x12a   : > { %v2157_v24 = vadd.f32 %v1581_v15, %v1541_v22  ;;  %v656_v25 = vpop.f32.mrb[29].mxu0  ;;  %v988_v22 = vmax.f32 %v2216_v7, 0.0 }
 0x12b   : > { %v2159_v27 = vadd.f32 %v889_v17, %v656_v25  ;;  %v1542_v28 = vpop.f32.mrb[30].mxu0  ;;  %v987_v17 = vmax.f32 %v2210_v3, 0.0  ;;  %v921_v25 = vmul.f32 %v2168_v36, %v2117_v19  ;;  %v990_v19 = vmax.f32 %v2235_v21, 0.0 }
 0x12c   : > { %v2161_v29 = vadd.f32 %v1582_v18, %v1542_v28  ;;  %v659_v30 = vpop.f32.mrb[31].mxu0  ;;  %v920_v18 = vmul.f32 %v2168_v36, %v2123_v26 }
 0x12d   : > { %v2163_v32 = vadd.f32 %v892_v20, %v659_v30  ;;  %v989_v30 = vmax.f32 %v2224_v11, 0.0 }
 0x12e   : > { %v2243_v26 = vadd.f32 %v2175_v42, %v920_v18 }
 0x131   : > { %v1553_v34 = vpop.f32.mrb[0].mxu0 }
 0x132   : > { %v777_v37 = vpop.f32.mrb[1].mxu0  ;;  %v913_v39 = vmul.f32 %v1553_v34, %v2168_v36  ;;  %v922_v34 = vmul.f32 %v2168_v36, %v2121_v23  ;;  %v991_v23 = vmax.f32 %v2243_v26, 0.0 }
 0x133   : > { %v911_v40 = vmul.f32 %v2168_v36, %v777_v37  ;;  %v1554_v41 = vpop.f32.mrb[2].mxu0 }
 0x134   : > { %v780_v45 = vpop.f32.mrb[3].mxu0  ;;  %v914_v50 = vmul.f32 %v1554_v41, %v2168_v36  ;;  %v2185_v54 = vadd.f32 %v2175_v42, %v913_v39  ;;  %v2248_v39 = vadd.f32 %v2175_v42, %v921_v25  ;;  %v928_v25 = vmul.f32 %v2168_v36, %v2139_v52 }
 0x135   : > { %v2178_v48 = vadd.f32 %v2175_v42, %v911_v40  ;;  %v912_v51 = vmul.f32 %v2168_v36, %v780_v45  ;;  %v923_v40 = vmul.f32 %v2168_v36, %v2127_v33  ;;  %v2256_v45 = vadd.f32 %v2175_v42, %v922_v34 }
 0x136   : > { %v2194_v60 = vadd.f32 %v2175_v42, %v914_v50  ;;  %v984_v1 = vmax.f32 %v2185_v54, 0.0  ;;  %v924_v50 = vmul.f32 %v2168_v36, %v2131_v38  ;;  %v992_v53 = vmax.f32 %v2248_v39, 0.0 }
 0x137   : > { %v2188_v55 = vadd.f32 %v2175_v42, %v912_v51  ;;  %v982_v58 = vmax.f32 %v2178_v48, 0.0  ;;  %v2267_v33 = vadd.f32 %v2175_v42, %v923_v40  ;;  %v996_v34 = vmax.f32 %v2280_v13, 0.0 }
 0x138   : > { %v985_v4 = vmax.f32 %v2194_v60, 0.0  ;;  %v2275_v38 = vadd.f32 %v2175_v42, %v924_v50  ;;  %v930_v50 = vmul.f32 %v2168_v36, %v2137_v49  ;;  %v2307_v52 = vadd.f32 %v2175_v42, %v928_v25 }
 0x139   : > { %v983_v62 = vmax.f32 %v2188_v55, 0.0  ;;  %v994_v31 = vmax.f32 %v2267_v33, 0.0 }
 0x13a   : > { %v995_v35 = vmax.f32 %v2275_v38, 0.0  ;;  %v2604_v49 = vmax.f32 %v2307_v52, 0.0  ;;  %v2623_v11 = vmax.f32 %v2307_v52, 0.0 }
 0x13b   : > { %v1014_v14 = vadd.f32 %v983_v62, %v982_v58 }
 0x13d   : > { %v1015_v6 = vadd.f32 %v1014_v14, %v984_v1  ;;  %v993_v14 = vmax.f32 %v2256_v45, 0.0 }
 0x13f   : > { %v1016_v15 = vadd.f32 %v1015_v6, %v985_v4 }
 0x141   : > { %v1017_v20 = vadd.f32 %v1016_v15, %v986_v10  ;;  %v927_v15 = vmul.f32 %v2168_v36, %v2135_v47 }
 0x143   : > { %v1018_v28 = vadd.f32 %v1017_v20, %v987_v17  ;;  %v2288_v20 = vadd.f32 %v2175_v42, %v926_v2  ;;  %v2299_v47 = vadd.f32 %v2175_v42, %v927_v15  ;;  %v932_v15 = vmul.f32 %v2168_v36, %v2147_v0 }
 0x145   : > { %v1019_v37 = vadd.f32 %v1018_v28, %v988_v22  ;;  %v2339_v0 = vadd.f32 %v2175_v42, %v932_v15  ;;  %v936_v15 = vmul.f32 %v2168_v36, %v2155_v16  ;;  %v2621_v3 = vmax.f32 %v2288_v20, 0.0 }
 0x146   : > { %v2622_v7 = vmax.f32 %v2299_v47, 0.0 }
 0x147   : > { %v1020_v41 = vadd.f32 %v1019_v37, %v989_v30  ;;  %v929_v37 = vmul.f32 %v2168_v36, %v2133_v44  ;;  %v2615_v44 = vmax.f32 %v2299_v47, 0.0  ;;  %v2371_v16 = vadd.f32 %v2175_v42, %v936_v15 }
 0x148   : > { %v940_v15 = vmul.f32 %v2168_v36, %v2163_v32  ;;  %v2627_v45 = vmax.f32 %v2339_v0, 0.0 }
 0x149   : > { %v1021_v51 = vadd.f32 %v1020_v41, %v990_v19  ;;  %v2618_v41 = vmax.f32 %v2288_v20, 0.0  ;;  %v2312_v56 = vadd.f32 %v2175_v42, %v929_v37  ;;  %v2631_v20 = vmax.f32 %v2371_v16, 0.0 }
 0x14a   : > { %v2403_v32 = vadd.f32 %v2175_v42, %v940_v15 }
 0x14b   : > { %v1022_v63 = vadd.f32 %v1021_v51, %v991_v23  ;;  %v2605_v25 = vmax.f32 %v2312_v56, 0.0 }
 0x14d   : > { %v1023_v6 = vadd.f32 %v1022_v63, %v992_v53  ;;  %v931_v63 = vmul.f32 %v2168_v36, %v2143_v59 }
 0x14f   : > { %v1024_v18 = vadd.f32 %v1023_v6, %v993_v14  ;;  %v2320_v6 = vadd.f32 %v2175_v42, %v930_v50  ;;  %v2331_v59 = vadd.f32 %v2175_v42, %v931_v63  ;;  %v934_v50 = vmul.f32 %v2168_v36, %v2145_v61 }
 0x150   : > { %v935_v63 = vmul.f32 %v2168_v36, %v2151_v8  ;;  %v2608_v61 = vmax.f32 %v2339_v0, 0.0 }
 0x151   : > { %v1025_v28 = vadd.f32 %v1024_v18, %v994_v31  ;;  %v2626_v39 = vmax.f32 %v2331_v59, 0.0 }
 0x152   : > { %v2363_v8 = vadd.f32 %v2175_v42, %v935_v63  ;;  %v939_v63 = vmul.f32 %v2168_v36, %v2159_v27 }
 0x153   : > { %v1026_v40 = vadd.f32 %v1025_v28, %v995_v35  ;;  %v933_v28 = vmul.f32 %v2168_v36, %v2141_v57  ;;  %v2607_v57 = vmax.f32 %v2331_v59, 0.0  ;;  %v2635_v59 = vmax.f32 %v2403_v32, 0.0 }
 0x154   : > { %v2395_v27 = vadd.f32 %v2175_v42, %v939_v63  ;;  %v2630_v13 = vmax.f32 %v2363_v8, 0.0 }
 0x155   : > { %v1027_v51 = vadd.f32 %v1026_v40, %v996_v34  ;;  %v2606_v40 = vmax.f32 %v2320_v6, 0.0 }
 0x157   : > { %v1028_v2 = vadd.f32 %v1027_v51, %v2618_v41 }
 0x159   : > { %v1029_v18 = vadd.f32 %v1028_v2, %v2615_v44  ;;  %v2344_v2 = vadd.f32 %v2175_v42, %v933_v28 }
 0x15b   : > { %v1030_v37 = vadd.f32 %v1029_v18, %v2604_v49  ;;  %v2352_v49 = vadd.f32 %v2175_v42, %v934_v50 }
 0x15d   : > { %v1031_v51 = vadd.f32 %v1030_v37, %v2605_v25  ;;  %v2609_v37 = vmax.f32 %v2344_v2, 0.0  ;;  %v937_v25 = vmul.f32 %v2168_v36, %v2149_v5  ;;  %v2611_v5 = vmax.f32 %v2363_v8, 0.0 }
 0x15f   : > { %v1032_v18 = vadd.f32 %v1031_v51, %v2606_v40  ;;  %v2610_v51 = vmax.f32 %v2352_v49, 0.0  ;;  %v938_v40 = vmul.f32 %v2168_v36, %v2153_v12  ;;  %v2612_v12 = vmax.f32 %v2371_v16, 0.0 }
 0x161   : > { %v1033_v28 = vadd.f32 %v1032_v18, %v2607_v57  ;;  %v2376_v57 = vadd.f32 %v2175_v42, %v937_v25 }
 0x163   : > { %v1034_v50 = vadd.f32 %v1033_v28, %v2608_v61  ;;  %v2384_v61 = vadd.f32 %v2175_v42, %v938_v40 }
 0x165   : > { %v1035_v18 = vadd.f32 %v1034_v50, %v2609_v37  ;;  %v2614_v50 = vmax.f32 %v2376_v57, 0.0  ;;  %v941_v37 = vmul.f32 %v2168_v36, %v2157_v24  ;;  %v2617_v24 = vmax.f32 %v2395_v27, 0.0 }
 0x166   : > { %v2633_v52 = vmax.f32 %v2384_v61, 0.0 }
 0x167   : > { %v1036_v28 = vadd.f32 %v1035_v18, %v2610_v51  ;;  %v2613_v18 = vmax.f32 %v2384_v61, 0.0  ;;  %v942_v51 = vmul.f32 %v2168_v36, %v2161_v29 }
 0x169   : > { %v1037_v25 = vadd.f32 %v1036_v28, %v2611_v5  ;;  %v2408_v5 = vadd.f32 %v2175_v42, %v941_v37 }
 0x16b   : > { %v1038_v40 = vadd.f32 %v1037_v25, %v2612_v12  ;;  %v2414_v25 = vadd.f32 %v2175_v42, %v942_v51  ;;  %v2616_v12 = vmax.f32 %v2403_v32, 0.0  ;;  %v1012_v36 = vmax.f32 %v2408_v5, 0.0 }
 0x16d   : > { %v1039_v28 = vadd.f32 %v1038_v40, %v2614_v50  ;;  %v1013_v37 = vmax.f32 %v2414_v25, 0.0 }
 0x16f   : > { %v1040_v63 = vadd.f32 %v1039_v28, %v2613_v18 }
 0x171   : > { %v1041_v29 = vadd.f32 %v1040_v63, %v2617_v24  ;;  %v1139_v63 = vld [vmem:[%s2602_s7] sm:$0xff] }
 0x173   : > { %v1042_v15 = vadd.f32 %v1041_v29, %v2616_v12  ;;  %v1140_v29 = vld [vmem:[%s2602_s7 + $0x8] sm:$0xff] }
 0x174   : > { %v1654_v24 = vpack.c.bf16 %v1140_v29, %v1139_v63 }
 0x175   : > { %v1043_v40 = vadd.f32 %v1042_v15, %v1012_v36  ;;  %v1142_v15 = vld [vmem:[%s2602_s7 + $0x18] sm:$0xff] }
 0x177   : > { %v1044_v28 = vadd.f32 %v1043_v40, %v1013_v37 }
 0x179   : > { %v1045_v42 = vrot.slane %v1044_v28, 4 }
 0x17b   : > { %v1046_v51 = vadd.f32 %v1045_v42, %v1044_v28  ;;  %v1224_v42 = vlaneseq }
 0x17d   : > { %v1047_v18 = vrot.slane %v1046_v51, 2 }
 0x17f   : > { %v1048_v50 = vadd.f32 %v1047_v18, %v1046_v51  ;;  %v1141_v18 = vld [vmem:[%s2602_s7 + $0x10] sm:$0xff]  ;;  %v1225_v51 = vshrl.u32 %v1224_v42, 7 }
 0x180   : > { %v1657_v40 = vpack.c.bf16 %v1142_v15, %v1141_v18 }
 0x181   : > { %v1049_v44 = vrot.slane %v1048_v50, 1  ;;  %v1226_v63 = vsub.s32 0, %v1225_v51 }
 0x183   : > { %v1050_v12 = vadd.f32 %v1049_v44, %v1048_v50 }
 0x185   : > { %v1051_v41 = vmul.f32 0.00390625, %v1050_v12 }
 0x187   : > { %1616 = vmatmul.mubr.f32.vlgmr.msra.gmra.mrb[28].mxu1 %v1051_v41 }
 0x188   : > { %1655 = vmatpush3.bf16.msra.mxu1 %v1654_v24  ;;  %1626 = vmatprep.mubr.msk.f32.mxu1 %vm1820_vm1, %v1821_v46 }
 0x189   : > { %1656 = vmatprep.subr.bf16.mxu1 %v1819_v43 }
 0x18c   : > { %1658 = vmatpush3.bf16.msra.mxu1 %v1657_v40 }
 0x25a   : > { %v1134_v44 = vpop.f32.mrb[28].mxu1 }
 0x25b   : > { %v1138_v41 = vmax.f32 %v1134_v44, 0.0  ;;  %v1617_v12 = vpop.f32.mrb[29].mxu1 }
 0x25d   : > { %1627 = vmatmul.mubr.msk.f32.vlgmr.msra.gmra.mrb[30].mxu1 %vm1143_vm2, %v1138_v41 }
 0x330   : > { %v1213_v46 = vpop.f32.mrb[30].mxu1 }
 0x331   : > { %v1432_v50 = vmul.f32 -1.442695, %v1213_v46  ;;  %v1628_v43 = vpop.f32.mrb[31].mxu1 }
 0x333   : > { %1751 = vpow2.f32 %v1432_v50 }
 0x33d   : > { %v1752_v24 = vpop.eup %1751 }
 0x33e   : > { %v1220_v28 = vadd.f32 1.0, %v1752_v24 }
 0x340   : > { %1753 = vrcp.f32 %v1220_v28 }
 0x34a   : > { %v1754_v29 = vpop.eup %1753 }
 0x34b   : > { %v1223_v18 = vadd.f32 1.0, %v1754_v29 }
 0x34d   : > { %v1227_v15 = vrot.slane %v1223_v18, %v1226_v63 }
 0x34f   : > { %v1228_v40 = vmul.f32 %v1227_v15, %v982_v58  ;;  %v1229_v44 = vmul.f32 %v1227_v15, %v983_v62  ;;  %v1230_v41 = vmul.f32 %v1227_v15, %v984_v1  ;;  %v1231_v12 = vmul.f32 %v1227_v15, %v985_v4 }
 0x350   : > { %v1232_v46 = vmul.f32 %v1227_v15, %v986_v10  ;;  %v1233_v50 = vmul.f32 %v1227_v15, %v987_v17  ;;  %v1234_v43 = vmul.f32 %v1227_v15, %v988_v22  ;;  %v1235_v48 = vmul.f32 %v1227_v15, %v989_v30 }
 0x351   : > { %v1236_v55 = vmul.f32 %v1227_v15, %v990_v19  ;;  %v1237_v54 = vmul.f32 %v1227_v15, %v991_v23  ;;  %v1238_v58 = vmul.f32 %v1227_v15, %v992_v53  ;;  %v1239_v60 = vmul.f32 %v1227_v15, %v993_v14  ;;  %1260 = vst [vmem:[%s2469_s22] sm:$0xff] %v1228_v40 }
 0x352   : > { %1261 = vst [vmem:[%s2469_s22 + $0x8] sm:$0xff] %v1229_v44  ;;  %1262 = vst [vmem:[%s2469_s22 + $0x10] sm:$0xff] %v1230_v41  ;;  %v1240_v62 = vmul.f32 %v1227_v15, %v994_v31  ;;  %v1241_v9 = vmul.f32 %v1227_v15, %v995_v35  ;;  %v1242_v1 = vmul.f32 %v1227_v15, %v996_v34  ;;  %v2624_v22 = vmax.f32 %v2312_v56, 0.0 }
 0x353   : > { %1263 = vst [vmem:[%s2469_s22 + $0x18] sm:$0xff] %v1231_v12  ;;  %v1243_v4 = vmul.f32 %v1227_v15, %v2621_v3  ;;  %1264 = vst [vmem:[%s2469_s22 + $0x20] sm:$0xff] %v1232_v46  ;;  %v1244_v10 = vmul.f32 %v1227_v15, %v2622_v7  ;;  %v1245_v17 = vmul.f32 %v1227_v15, %v2623_v11  ;;  %v2625_v30 = vmax.f32 %v2320_v6, 0.0 }
 0x354   : > { %1265 = vst [vmem:[%s2469_s22 + $0x28] sm:$0xff] %v1233_v50  ;;  %1266 = vst [vmem:[%s2469_s22 + $0x30] sm:$0xff] %v1234_v43  ;;  %v1246_v21 = vmul.f32 %v1227_v15, %v2624_v22  ;;  %v1248_v19 = vmul.f32 %v1227_v15, %v2626_v39  ;;  %v1249_v23 = vmul.f32 %v1227_v15, %v2627_v45  ;;  %v2628_v53 = vmax.f32 %v2344_v2, 0.0 }
 0x355   : > { %1267 = vst [vmem:[%s2469_s22 + $0x38] sm:$0xff] %v1235_v48  ;;  %v1247_v26 = vmul.f32 %v1227_v15, %v2625_v30  ;;  %1268 = vst [vmem:[%s2469_s22 + $0x40] sm:$0xff] %v1236_v55  ;;  %v2629_v14 = vmax.f32 %v2352_v49, 0.0  ;;  %v1252_v31 = vmul.f32 %v1227_v15, %v2630_v13  ;;  %v1253_v35 = vmul.f32 %v1227_v15, %v2631_v20 }
 0x356   : > { %1269 = vst [vmem:[%s2469_s22 + $0x48] sm:$0xff] %v1237_v54  ;;  %1270 = vst [vmem:[%s2469_s22 + $0x50] sm:$0xff] %v1238_v58  ;;  %v1250_v33 = vmul.f32 %v1227_v15, %v2628_v53  ;;  %v2632_v34 = vmax.f32 %v2376_v57, 0.0  ;;  %v1255_v56 = vmul.f32 %v1227_v15, %v2633_v52  ;;  %v2634_v6 = vmax.f32 %v2395_v27, 0.0 }
 0x357   : > { %1271 = vst [vmem:[%s2469_s22 + $0x58] sm:$0xff] %v1239_v60  ;;  %v1251_v38 = vmul.f32 %v1227_v15, %v2629_v14  ;;  %1272 = vst [vmem:[%s2469_s22 + $0x60] sm:$0xff] %v1240_v62  ;;  %v1257_v0 = vmul.f32 %v1227_v15, %v2635_v59  ;;  %v1258_v2 = vmul.f32 %v1227_v15, %v1012_v36 }
 0x358   : > { %1273 = vst [vmem:[%s2469_s22 + $0x68] sm:$0xff] %v1241_v9  ;;  %1274 = vst [vmem:[%s2469_s22 + $0x70] sm:$0xff] %v1242_v1  ;;  %v1254_v47 = vmul.f32 %v1227_v15, %v2632_v34  ;;  %v1256_v49 = vmul.f32 %v1227_v15, %v2634_v6  ;;  %v1259_v57 = vmul.f32 %v1227_v15, %v1013_v37 }
 0x359   : > { %1275 = vst [vmem:[%s2469_s22 + $0x78] sm:$0xff] %v1243_v4  ;;  %1276 = vst [vmem:[%s2469_s22 + $0x80] sm:$0xff] %v1244_v10 }
 0x35a   : > { %1277 = vst [vmem:[%s2469_s22 + $0x88] sm:$0xff] %v1245_v17  ;;  %1278 = vst [vmem:[%s2469_s22 + $0x90] sm:$0xff] %v1246_v21 }
 0x35b   : > { %1279 = vst [vmem:[%s2469_s22 + $0x98] sm:$0xff] %v1247_v26  ;;  %1280 = vst [vmem:[%s2469_s22 + $0xa0] sm:$0xff] %v1248_v19 }
 0x35c   : > { %1281 = vst [vmem:[%s2469_s22 + $0xa8] sm:$0xff] %v1249_v23  ;;  %1282 = vst [vmem:[%s2469_s22 + $0xb0] sm:$0xff] %v1250_v33 }
 0x35d   : > { %1283 = vst [vmem:[%s2469_s22 + $0xb8] sm:$0xff] %v1251_v38  ;;  %1284 = vst [vmem:[%s2469_s22 + $0xc0] sm:$0xff] %v1252_v31 }
 0x35e   : > { %1285 = vst [vmem:[%s2469_s22 + $0xc8] sm:$0xff] %v1253_v35  ;;  %1286 = vst [vmem:[%s2469_s22 + $0xd0] sm:$0xff] %v1254_v47 }
 0x35f   : > { %1287 = vst [vmem:[%s2469_s22 + $0xd8] sm:$0xff] %v1255_v56  ;;  %1288 = vst [vmem:[%s2469_s22 + $0xe0] sm:$0xff] %v1256_v49 }
 0x360   : > { %1289 = vst [vmem:[%s2469_s22 + $0xe8] sm:$0xff] %v1257_v0  ;;  %1290 = vst [vmem:[%s2469_s22 + $0xf0] sm:$0xff] %v1258_v2 }
 0x361   : > { %1291 = vst [vmem:[%s2469_s22 + $0xf8] sm:$0xff] %v1259_v57 }
 0x362   : > { %1768 = shalt.err (!%p1765_p3)
}
 0x363   : > { %s1769_s19 = scalar_lea.hbm %s2528_s26, 4096  ;;  %s1773_s22 = scalar_lea.hbm %s2603_s8, 8192 }
 0x364   : > { %p1770_p4 = scmp.ne.s32.totalorder %s2528_s26, %s1769_s19  ;;  %p1774_p9 = scmp.lt.u32.totalorder %s2528_s26, %s2603_s8 }
 0x365   : > { %p1775_p10 = scmp.lt.u32.totalorder %s1773_s22, %s1769_s19  ;;  %p1777_p12 = scmp.lt.u32.totalorder %s1769_s19, %s2528_s26 }
 0x366   : > { %p1771_p7 = pnand %p1770_p4, %p1908_p5 }
 0x367   : > { %p1776_p11 = por %p1775_p10, %p1774_p9 }
 0x368   : > { %p1772_p8 = pneg %p1771_p7 }
 0x369   : > { %p1778_p13 = por %p1777_p12, %p1776_p11 }
 0x36b   : > { %p1779_p0 = pnand %p1778_p13, %p1772_p8 }
 0x36d   : > { %1782 = shalt.err (!%p1779_p0)
}
 0x36e   : > { %s1823_s25 = smov 128   ;;  %s1824_s12 = smov 8  }
 0x36f   : > { %1699 = dma.vmem_to_hbm [thread:$0]  (%p1908_p5), %s2530_s24, 4096, %s2528_s26, %s2554_s10, %s1823_s25, %s1823_s25, %s1824_s12  }
 0x370 PF: > { %p1705_p1 = scmp.ge.s32.totalorder %s1817_s30, 2  ;;  %s1321_s13 = sand.u32 1, %s1805_s27  }
 0x371   : > { %s1322_s17 = scalar_lea.sflag [#allocation3], %s1321_s13 }
 0x372   : > { %p1702_p2 = pnand %p1705_p1, %p1912_p6 }
 0x374   : > { %1800 = dma.done.wait (!%p1702_p2), %s1322_s17, 4096  }
 0x375   : > { %1802 = vsyncadd (!%p1702_p2), %s1322_s17, 4294963200  ;;  %p18_p3 = scmp.ge.s32.totalorder %s1895_s11, 4   ;;  %s2636_s27 = smov %s1809_s28 }
 0x376   : > { %s2637_s28 = smov %s1813_s29  ;;  %s2638_s29 = smov %s1906_s14 }
 0x377   : > { %s2639_s30 = smov %s1895_s11  ;;  %20 = sbr.rel (!%p18_p3) target bundleno = 3 (0x3), region = 90 }
 0x37e   :  { %1327 = vsyncpa [#allocation3], 1 }
 0x37f   :  { %1329 = vsyncpa [#allocation3 + $0x1], 1 }

</bundles_post_ra>
